<compile_context>
chip_gen: v5e
topology: v5e:2x2
jax: 0.10.0
libtpu: 0.0.40
codegen_flags: <defaults>
</compile_context>

<pallas_src>
import functools

import jax
import jax.numpy as jnp
from jax.experimental import pallas as pl
from jax.experimental.pallas import tpu as pltpu

LANE = 128
_MiB = 1024 * 1024
# Monolithic (everything resident in VMEM) path is only used while it fits
# comfortably on every generation (v7x has 64 MiB physical VMEM per core).
_MONO_VMEM_BUDGET = 48 * _MiB


def _round_up(v, m):
    return (v + m - 1) // m * m


# ----------------------------------------------------------------------------
# Kernel 1: fully fused GCN stack (single pallas_call, no grid).
#   refs = (a, x, w_0..w_{L-1}, shift_0..shift_{L-1}, out)
# ----------------------------------------------------------------------------
def _gcn_fused_kernel(*refs, n_layers):
    a_ref, x_ref = refs[0], refs[1]
    w_refs = refs[2:2 + n_layers]
    shift_refs = refs[2 + n_layers:2 + 2 * n_layers]
    o_ref = refs[2 + 2 * n_layers]

    a = a_ref[...]                                   # (Np, Np) bf16, resident all layers
    h = x_ref[...]                                   # (Np, c0) bf16 activation
    for i in range(n_layers):                        # static unroll (compile-time L)
        # feature transform first (c is small), then aggregation; f32 accumulate
        xw = jnp.dot(h, w_refs[i][...], preferred_element_type=jnp.float32)
        hf = jnp.dot(a, xw.astype(jnp.bfloat16), preferred_element_type=jnp.float32)
        hf = hf + shift_refs[i][...]                 # folded conv-bias + BN shift (f32)
        if i < n_layers - 1:
            h = jnp.maximum(hf, 0.0).astype(jnp.bfloat16)  # ReLU; dropout=identity (eval)
    o_ref[...] = hf.astype(o_ref.dtype)


# ----------------------------------------------------------------------------
# Kernel 2: one GCN layer with row-tiled, streamed A (for graphs too big for
# the monolithic path).  xw = h @ W is computed once (first row tile) into a
# VMEM scratch that persists across grid steps; A row blocks are pipelined by
# BlockSpec against the A_tile @ xw matmul.
# ----------------------------------------------------------------------------
def _gcn_layer_tiled_kernel(a_ref, h_ref, w_ref, shift_ref, o_ref, xw_ref, *, relu):
    @pl.when(pl.program_id(0) == 0)
    def _():
        xw_ref[...] = jnp.dot(
            h_ref[...], w_ref[...], preferred_element_type=jnp.float32
        ).astype(xw_ref.dtype)

    acc = jnp.dot(a_ref[...], xw_ref[...], preferred_element_type=jnp.float32)
    acc = acc + shift_ref[...]
    if relu:
        acc = jnp.maximum(acc, 0.0)
    o_ref[...] = acc.astype(o_ref.dtype)


# ----------------------------------------------------------------------------
# Parameter folding + per-layer padding (wrapper-side, trace time, tiny tensors)
# ----------------------------------------------------------------------------
def _fold_and_pad_params(layers, input_dim):
    n_layers = len(layers)
    dims = [input_dim] + [layer["w"].shape[1] for layer in layers]
    c_pads = [_round_up(d, LANE) for d in dims]       # per-layer padding (not max(dims))
    w_pads, shift_pads = [], []
    for i, layer in enumerate(layers):
        w = layer["w"].astype(jnp.float32)
        b = layer["b"].astype(jnp.float32)
        if i < n_layers - 1:
            # eval-mode BN folded: scale into W columns, shift kept as an add
            bn_scale = layer["gamma"] / jnp.sqrt(layer["var"] + 1e-5)
            w = w * bn_scale[None, :]
            shift = bn_scale * (b - layer["mean"]) + layer["beta"]
        else:
            shift = b
        wp = jnp.zeros((c_pads[i], c_pads[i + 1]), jnp.bfloat16)
        wp = wp.at[: dims[i], : dims[i + 1]].set(w.astype(jnp.bfloat16))
        sp = jnp.zeros((1, c_pads[i + 1]), jnp.float32).at[0, : dims[i + 1]].set(shift)
        w_pads.append(wp)
        shift_pads.append(sp)
        # Padded channels keep W cols = 0 and shift = 0, so zeros propagate
        # cleanly through every layer.
    return dims, c_pads, w_pads, shift_pads


def _fused_vmem_bytes(n, dims, c_pads):
    n_pad = _round_up(n, LANE)
    n_layers = len(dims) - 1
    return (
        2 * n_pad * n_pad                                        # A (bf16)
        + 2 * n_pad * c_pads[0]                                  # x (bf16)
        + sum(2 * c_pads[i] * c_pads[i + 1] for i in range(n_layers))
        + sum(4 * c_pads[i + 1] for i in range(n_layers))
        + 4 * n_pad * c_pads[-1]                                 # output (f32)
        + 12 * n_pad * max(c_pads)                               # f32 temporaries headroom
    )


# ----------------------------------------------------------------------------
# Path A: fused monolithic forward
# ----------------------------------------------------------------------------
def _gcn_forward_fused(x, a_hat, dims, c_pads, w_pads, shift_pads):
    n = x.shape[0]
    n_layers = len(w_pads)
    n_pad = _round_up(n, LANE)

    a_pad = jnp.zeros((n_pad, n_pad), jnp.bfloat16).at[:n, :n].set(a_hat.astype(jnp.bfloat16))
    x_pad = jnp.zeros((n_pad, c_pads[0]), jnp.bfloat16).at[:n, : dims[0]].set(x.astype(jnp.bfloat16))

    flops = sum(
        2 * n_pad * c_pads[i] * c_pads[i + 1] + 2 * n_pad * n_pad * c_pads[i + 1]
        for i in range(n_layers)
    )
    in_bytes = (
        2 * a_pad.size + 2 * x_pad.size
        + sum(2 * w.size for w in w_pads) + sum(4 * s.size for s in shift_pads)
    )
    out_bytes = 4 * n_pad * c_pads[-1]
    vmem_limit = int(min(max(32 * _MiB, 1.25 * _fused_vmem_bytes(n, dims, c_pads)), 100 * _MiB))

    in_specs = [
        pl.BlockSpec((n_pad, n_pad), lambda: (0, 0)),
        pl.BlockSpec((n_pad, c_pads[0]), lambda: (0, 0)),
    ]
    in_specs += [pl.BlockSpec((c_pads[i], c_pads[i + 1]), lambda: (0, 0)) for i in range(n_layers)]
    in_specs += [pl.BlockSpec((1, c_pads[i + 1]), lambda: (0, 0)) for i in range(n_layers)]

    out = pl.pallas_call(
        functools.partial(_gcn_fused_kernel, n_layers=n_layers),
        out_shape=jax.ShapeDtypeStruct((n_pad, c_pads[-1]), jnp.float32),
        in_specs=in_specs,
        out_specs=pl.BlockSpec((n_pad, c_pads[-1]), lambda: (0, 0)),
        compiler_params=pltpu.CompilerParams(vmem_limit_bytes=vmem_limit),
        cost_estimate=pl.CostEstimate(
            flops=flops, transcendentals=0, bytes_accessed=in_bytes + out_bytes
        ),
    )(a_pad, x_pad, *w_pads, *shift_pads)
    return out[:n, : dims[-1]]


# ----------------------------------------------------------------------------
# Path B: per-layer row-tiled forward with streamed A (removes the O(N^2)-in-VMEM cliff)
# ----------------------------------------------------------------------------
def _gcn_forward_tiled(x, a_hat, dims, c_pads, w_pads, shift_pads, tile_m):
    n = x.shape[0]
    n_layers = len(w_pads)
    tile_m = _round_up(tile_m, LANE)
    n_pad = _round_up(n, tile_m)

    a_pad = jnp.zeros((n_pad, n_pad), jnp.bfloat16).at[:n, :n].set(a_hat.astype(jnp.bfloat16))
    h = jnp.zeros((n_pad, c_pads[0]), jnp.bfloat16).at[:n, : dims[0]].set(x.astype(jnp.bfloat16))

    for li in range(n_layers):
        last = li == n_layers - 1
        c_in, c_out = c_pads[li], c_pads[li + 1]
        out_dtype = jnp.float32 if last else jnp.bfloat16
        vmem_est = (
            2 * tile_m * n_pad * 2            # A row tiles (double-buffered, bf16)
            + 2 * n_pad * c_in * 2            # resident h (conservative x2)
            + 2 * c_in * c_out * 2            # W
            + 2 * tile_m * c_out * (4 if last else 2)
            + n_pad * c_out * 2               # xw scratch (bf16)
            + 4 * n_pad * c_out               # f32 temporaries headroom
        )
        vmem_limit = int(min(max(32 * _MiB, 1.5 * vmem_est), 100 * _MiB))
        # TODO(synk): on v7x the row axis could be "parallel" across the 2 TensorCores
        # if xw is computed per-core (or in its own pallas_call); kept "arbitrary"
        # here because the xw scratch is filled only on the first grid step.
        h = pl.pallas_call(
            functools.partial(_gcn_layer_tiled_kernel, relu=not last),
            out_shape=jax.ShapeDtypeStruct((n_pad, c_out), out_dtype),
            grid=(n_pad // tile_m,),
            in_specs=[
                pl.BlockSpec((tile_m, n_pad), lambda r: (r, 0)),   # streamed A row block
                pl.BlockSpec((n_pad, c_in), lambda r: (0, 0)),     # resident h
                pl.BlockSpec((c_in, c_out), lambda r: (0, 0)),     # resident W
                pl.BlockSpec((1, c_out), lambda r: (0, 0)),        # resident shift
            ],
            out_specs=pl.BlockSpec((tile_m, c_out), lambda r: (r, 0)),
            scratch_shapes=[pltpu.VMEM((n_pad, c_out), jnp.bfloat16)],
            compiler_params=pltpu.CompilerParams(
                dimension_semantics=("arbitrary",),
                vmem_limit_bytes=vmem_limit,
            ),
        )(a_pad, h, w_pads[li], shift_pads[li])
    return h[:n, : dims[-1]]


# ----------------------------------------------------------------------------
# Public forward
# ----------------------------------------------------------------------------
def gcn_forward(x, a_hat, layers, *, tile_m=256, force_tiled=False):
    """layers: list of dicts; every layer has 'w' (d_in,d_out) and 'b' (d_out,);
    hidden layers additionally have BatchNorm1d params 'gamma','beta','mean','var'.
    Eval-mode forward (dropout = identity, BN uses running stats)."""
    # TODO(synk): training-mode dropout / batch-statistics BN not implemented.
    dims, c_pads, w_pads, shift_pads = _fold_and_pad_params(layers, x.shape[1])
    if not force_tiled and _fused_vmem_bytes(x.shape[0], dims, c_pads) <= _MONO_VMEM_BUDGET:
        return _gcn_forward_fused(x, a_hat, dims, c_pads, w_pads, shift_pads)
    return _gcn_forward_tiled(x, a_hat, dims, c_pads, w_pads, shift_pads, tile_m)


# ----------------------------------------------------------------------------
# Pure-JAX reference (same bf16-matmul / f32-accumulate recipe) for checking
# ----------------------------------------------------------------------------
def gcn_reference(x, a_hat, layers):
    n_layers = len(layers)
    a = a_hat.astype(jnp.bfloat16)
    h = x.astype(jnp.bfloat16)
    for i, layer in enumerate(layers):
        w = layer["w"].astype(jnp.float32)
        b = layer["b"].astype(jnp.float32)
        if i < n_layers - 1:
            bn_scale = layer["gamma"] / jnp.sqrt(layer["var"] + 1e-5)
            w = w * bn_scale[None, :]
            shift = bn_scale * (b - layer["mean"]) + layer["beta"]
        else:
            shift = b
        xw = jnp.dot(h, w.astype(jnp.bfloat16), preferred_element_type=jnp.float32)
        hf = jnp.dot(a, xw.astype(jnp.bfloat16), preferred_element_type=jnp.float32) + shift
        if i < n_layers - 1:
            h = jnp.maximum(hf, 0.0).astype(jnp.bfloat16)
    return hf


# ----------------------------------------------------------------------------
# Glue: normalized adjacency and parameter construction
# ----------------------------------------------------------------------------
def build_normalized_adjacency(edge_index, num_nodes):
    """A_hat = D^{-1/2} (A + I) D^{-1/2}, with A[i, j] = 1 for edge j -> i."""
    # TODO(synk): real GCN graphs are sparse; a blocked-sparse aggregation via
    # PrefetchScalarGridSpec would avoid the dense O(N^2) A_hat entirely.
    src, dst = edge_index[0], edge_index[1]
    a = jnp.zeros((num_nodes, num_nodes), jnp.float32)
    a = a.at[dst, src].add(1.0)                          # message j -> i lands in row i
    a = a + jnp.eye(num_nodes, dtype=jnp.float32)        # add_self_loops (weight 1)
    deg = jnp.sum(a, axis=1)
    dinv = jnp.where(deg > 0, jax.lax.rsqrt(deg), 0.0)
    return dinv[:, None] * a * dinv[None, :]


def glorot(key, shape):
    fan_in, fan_out = shape
    limit = jnp.sqrt(6.0 / (fan_in + fan_out))
    return jax.random.uniform(key, shape, jnp.float32, -limit, limit)


def init_gcn_params(key, input_dim, hidden_dim, out_dim, n_layers):
    dims = [input_dim] + [hidden_dim] * (n_layers - 1) + [out_dim]
    layers = []
    for i in range(n_layers):
        key, wk = jax.random.split(key)
        layer = {
            "w": glorot(wk, (dims[i], dims[i + 1])),          # GCNConv.lin weight
            "b": jnp.zeros((dims[i + 1],), jnp.float32),      # GCNConv bias (zeros)
        }
        if i < n_layers - 1:
            layer["gamma"] = jnp.ones((dims[i + 1],), jnp.float32)
            layer["beta"] = jnp.zeros((dims[i + 1],), jnp.float32)
            layer["mean"] = jnp.zeros((dims[i + 1],), jnp.float32)
            layer["var"] = jnp.ones((dims[i + 1],), jnp.float32)
        layers.append(layer)
    return layers


# ----------------------------------------------------------------------------
if __name__ == "__main__":
    # Config matches the module constructor: hidden_channels=32, n_layers=3,
    # dropout=0.5 (eval -> identity), feat_type='manual'.
    INPUT_DIM, HIDDEN_DIM, OUT_DIM, N_LAYERS = 16, 32, 8, 3

    key = jax.random.PRNGKey(0)
    kp, k1, k2 = jax.random.split(key, 3)
    layers = init_gcn_params(kp, INPUT_DIM, HIDDEN_DIM, OUT_DIM, N_LAYERS)

    def make_graph(k, n_nodes, n_edges):
        kx, ke = jax.random.split(k)
        x = jax.random.normal(kx, (n_nodes, INPUT_DIM), jnp.float32)
        src = jax.random.randint(ke, (n_edges,), 0, n_nodes)
        dst = jax.random.randint(jax.random.fold_in(ke, 1), (n_edges,), 0, n_nodes)
        edge_index = jnp.stack(
            [jnp.concatenate([src, dst]), jnp.concatenate([dst, src])], axis=0
        )
        return x, build_normalized_adjacency(edge_index, n_nodes)

    # 1) small graph -> fused monolithic path (A_hat + activation resident in VMEM)
    x1, a1 = make_graph(k1, 64, 256)
    out1 = jax.block_until_ready(gcn_forward(x1, a1, layers))
    ref1 = gcn_reference(x1, a1, layers)
    assert out1.shape == (64, OUT_DIM) and out1.dtype == jnp.float32
    assert bool(jnp.all(jnp.isfinite(out1)))
    assert bool(jnp.allclose(out1, ref1, atol=3e-2, rtol=3e-2)), float(
        jnp.max(jnp.abs(out1 - ref1))
    )

    # 2) larger graph with the row-tiled streamed-A path forced (grid of 3 row tiles)
    x2, a2 = make_graph(k2, 300, 2400)
    out2 = jax.block_until_ready(
        gcn_forward(x2, a2, layers, tile_m=128, force_tiled=True)
    )
    ref2 = gcn_reference(x2, a2, layers)
    assert out2.shape == (300, OUT_DIM) and out2.dtype == jnp.float32
    assert bool(jnp.all(jnp.isfinite(out2)))
    assert bool(jnp.allclose(out2, ref2, atol=3e-2, rtol=3e-2)), float(
        jnp.max(jnp.abs(out2 - ref2))
    )

    print("KERNEL_OK")
</pallas_src>

<mosaic_0001>
module attributes {stable_mosaic.version = 11 : i64} {
  func.func @_gcn_fused_kernel(%arg0: memref<128x128xbf16, #tpu.memory_space<vmem>>, %arg1: memref<128x128xbf16, #tpu.memory_space<vmem>>, %arg2: memref<128x128xbf16, #tpu.memory_space<vmem>>, %arg3: memref<128x128xbf16, #tpu.memory_space<vmem>>, %arg4: memref<128x128xbf16, #tpu.memory_space<vmem>>, %arg5: memref<1x128xf32, #tpu.memory_space<vmem>>, %arg6: memref<1x128xf32, #tpu.memory_space<vmem>>, %arg7: memref<1x128xf32, #tpu.memory_space<vmem>>, %arg8: memref<128x128xf32, #tpu.memory_space<vmem>>) attributes {dimension_semantics = [], scalar_prefetch = 0 : i64, scratch_operands = 0 : i64, tpu.core_type = #tpu.core_type<tc>} {
    %c0 = arith.constant 0 : index
    %c0_0 = arith.constant 0 : index
    %0 = vector.load %arg0[%c0, %c0_0] : memref<128x128xbf16, #tpu.memory_space<vmem>>, vector<128x128xbf16>
    %c0_1 = arith.constant 0 : index
    %c0_2 = arith.constant 0 : index
    %1 = vector.load %arg1[%c0_1, %c0_2] : memref<128x128xbf16, #tpu.memory_space<vmem>>, vector<128x128xbf16>
    %c0_3 = arith.constant 0 : index
    %c0_4 = arith.constant 0 : index
    %2 = vector.load %arg2[%c0_3, %c0_4] : memref<128x128xbf16, #tpu.memory_space<vmem>>, vector<128x128xbf16>
    %cst = arith.constant dense<0.000000e+00> : vector<128x128xf32>
    %3 = tpu.matmul %1, %2, %cst {dimension_numbers = #tpu.dot_dimension_numbers<[1], [0], [0], [1], [0, 0, 1, 1], [], []>} : vector<128x128xbf16>, vector<128x128xbf16>, vector<128x128xf32> -> vector<128x128xf32>
    %4 = arith.truncf %3 : vector<128x128xf32> to vector<128x128xbf16>
    %cst_5 = arith.constant dense<0.000000e+00> : vector<128x128xf32>
    %5 = tpu.matmul %0, %4, %cst_5 {dimension_numbers = #tpu.dot_dimension_numbers<[1], [0], [0], [1], [0, 0, 1, 1], [], []>} : vector<128x128xbf16>, vector<128x128xbf16>, vector<128x128xf32> -> vector<128x128xf32>
    %c0_6 = arith.constant 0 : index
    %c0_7 = arith.constant 0 : index
    %6 = vector.load %arg5[%c0_6, %c0_7] : memref<1x128xf32, #tpu.memory_space<vmem>>, vector<1x128xf32>
    %7 = vector.broadcast %6 : vector<1x128xf32> to vector<128x128xf32>
    %8 = arith.addf %5, %7 : vector<128x128xf32>
    %cst_8 = arith.constant 0.000000e+00 : f32
    %9 = vector.broadcast %cst_8 : f32 to vector<128x128xf32>
    %10 = arith.maximumf %8, %9 : vector<128x128xf32>
    %11 = arith.truncf %10 : vector<128x128xf32> to vector<128x128xbf16>
    %c0_9 = arith.constant 0 : index
    %c0_10 = arith.constant 0 : index
    %12 = vector.load %arg3[%c0_9, %c0_10] : memref<128x128xbf16, #tpu.memory_space<vmem>>, vector<128x128xbf16>
    %cst_11 = arith.constant dense<0.000000e+00> : vector<128x128xf32>
    %13 = tpu.matmul %11, %12, %cst_11 {dimension_numbers = #tpu.dot_dimension_numbers<[1], [0], [0], [1], [0, 0, 1, 1], [], []>} : vector<128x128xbf16>, vector<128x128xbf16>, vector<128x128xf32> -> vector<128x128xf32>
    %14 = arith.truncf %13 : vector<128x128xf32> to vector<128x128xbf16>
    %cst_12 = arith.constant dense<0.000000e+00> : vector<128x128xf32>
    %15 = tpu.matmul %0, %14, %cst_12 {dimension_numbers = #tpu.dot_dimension_numbers<[1], [0], [0], [1], [0, 0, 1, 1], [], []>} : vector<128x128xbf16>, vector<128x128xbf16>, vector<128x128xf32> -> vector<128x128xf32>
    %c0_13 = arith.constant 0 : index
    %c0_14 = arith.constant 0 : index
    %16 = vector.load %arg6[%c0_13, %c0_14] : memref<1x128xf32, #tpu.memory_space<vmem>>, vector<1x128xf32>
    %17 = vector.broadcast %16 : vector<1x128xf32> to vector<128x128xf32>
    %18 = arith.addf %15, %17 : vector<128x128xf32>
    %cst_15 = arith.constant 0.000000e+00 : f32
    %19 = vector.broadcast %cst_15 : f32 to vector<128x128xf32>
    %20 = arith.maximumf %18, %19 : vector<128x128xf32>
    %21 = arith.truncf %20 : vector<128x128xf32> to vector<128x128xbf16>
    %c0_16 = arith.constant 0 : index
    %c0_17 = arith.constant 0 : index
    %22 = vector.load %arg4[%c0_16, %c0_17] : memref<128x128xbf16, #tpu.memory_space<vmem>>, vector<128x128xbf16>
    %cst_18 = arith.constant dense<0.000000e+00> : vector<128x128xf32>
    %23 = tpu.matmul %21, %22, %cst_18 {dimension_numbers = #tpu.dot_dimension_numbers<[1], [0], [0], [1], [0, 0, 1, 1], [], []>} : vector<128x128xbf16>, vector<128x128xbf16>, vector<128x128xf32> -> vector<128x128xf32>
    %24 = arith.truncf %23 : vector<128x128xf32> to vector<128x128xbf16>
    %cst_19 = arith.constant dense<0.000000e+00> : vector<128x128xf32>
    %25 = tpu.matmul %0, %24, %cst_19 {dimension_numbers = #tpu.dot_dimension_numbers<[1], [0], [0], [1], [0, 0, 1, 1], [], []>} : vector<128x128xbf16>, vector<128x128xbf16>, vector<128x128xf32> -> vector<128x128xf32>
    %c0_20 = arith.constant 0 : index
    %c0_21 = arith.constant 0 : index
    %26 = vector.load %arg7[%c0_20, %c0_21] : memref<1x128xf32, #tpu.memory_space<vmem>>, vector<1x128xf32>
    %27 = vector.broadcast %26 : vector<1x128xf32> to vector<128x128xf32>
    %28 = arith.addf %25, %27 : vector<128x128xf32>
    %c0_22 = arith.constant 0 : index
    %c0_23 = arith.constant 0 : index
    %29 = vector.load %arg8[%c0_22, %c0_23] : memref<128x128xf32, #tpu.memory_space<vmem>>, vector<128x128xf32>
    tpu.vector_store %arg8[%c0_22, %c0_23], %28 {strides = array<i32>} : memref<128x128xf32, #tpu.memory_space<vmem>>, vector<128x128xf32>,
    return
  }
}

</mosaic_0001>

<bundles_post_ra>
// kernel: tpu_custom_call.1
= control target key start
LH: loop header
LB: loop body
LE: loop exit
PB: predicated region body
PF: predicated region fallthrough
CT: control target
= control target key end

     0   :  { %13 = vsyncpa [#allocation3], 0  ;;  %s1346_s0 = inlined_call_operand.hbm [shape: bf16[128,128], index: 0, kind: input, shape index: {}]   ;;  %s1347_s1 = inlined_call_operand.hbm [shape: bf16[128,128], index: 1, kind: input, shape index: {}]   ;;  %s1348_s2 = inlined_call_operand.hbm [shape: bf16[128,128], index: 2, kind: input, shape index: {}]   ;;  %s1349_s3 = inlined_call_operand.hbm [shape: bf16[128,128], index: 3, kind: input, shape index: {}]   ;;  %s1350_s4 = inlined_call_operand.hbm [shape: bf16[128,128], index: 4, kind: input, shape index: {}]   ;;  %s1351_s5 = inlined_call_operand.vmem [shape: f32[1,128], index: 5, kind: input, shape index: {}]   ;;  %s1352_s6 = inlined_call_operand.vmem [shape: f32[1,128], index: 6, kind: input, shape index: {}]   ;;  %s1353_s7 = inlined_call_operand.vmem [shape: f32[1,128], index: 7, kind: input, shape index: {}]   ;;  %s1354_s8 = inlined_call_operand.hbm [shape: f32[128,128], index: 8, kind: output, shape index: {}]  }
   0x1   :  { %14 = vsyncpa [#allocation6], 0 }
   0x2   :  { %15 = vsyncpa [#allocation9], 0 }
   0x3   :  { %16 = vsyncpa [#allocation4], 0  ;;  %s34_s29 = sshll.u32 %s1347_s1, 4  ;;  %s1224_s30 = smov [#allocation5]   ;;  %s35_s29 = int_to_ptr.hbm [resolvable:$true] %s34_s29 }
   0x4   :  { %s36_s9 = sshll.u32 %s1224_s30, 4  ;;  %s60_s12 = sshll.u32 %s1349_s3, 4  ;;  %s37_s9 = int_to_ptr.vmem [resolvable:$true] %s36_s9  ;;  %s61_s12 = int_to_ptr.hbm [resolvable:$true] %s60_s12 }
   0x5   :  { %s1225_s13 = smov 64   ;;  %s1226_s14 = smov 4  }
   0x6   :  { %42 = dma.hbm_to_vmem [thread:$0]  %s35_s29, 1024, %s37_s9, [#allocation6], %s1225_s13, %s1225_s13, %s1226_s14  }
   0x7   :  { %s1227_s15 = smov [#allocation8]   ;;  %s21_s19 = sshll.u32 %s1346_s0, 4  ;;  %s22_s19 = int_to_ptr.hbm [resolvable:$true] %s21_s19 }
   0x8   :  { %s62_s16 = sshll.u32 %s1227_s15, 4  ;;  %s47_s21 = sshll.u32 %s1348_s2, 4  ;;  %s63_s16 = int_to_ptr.vmem [resolvable:$true] %s62_s16  ;;  %s48_s21 = int_to_ptr.hbm [resolvable:$true] %s47_s21 }
   0x9   :  { %68 = dma.hbm_to_vmem [thread:$0]  %s61_s12, 1024, %s63_s16, [#allocation9], %s1225_s13, %s1225_s13, %s1226_s14  }
   0xa   :  { %s1228_s22 = smov [#allocation2]   ;;  %s1229_s3 = smov [#allocation7]  }
   0xb   :  { %s23_s23 = sshll.u32 %s1228_s22, 4  ;;  %s49_s24 = sshll.u32 %s1229_s3, 4  ;;  %s24_s23 = int_to_ptr.vmem [resolvable:$true] %s23_s23  ;;  %s50_s24 = int_to_ptr.vmem [resolvable:$true] %s49_s24 }
   0xc   :  { %29 = dma.hbm_to_vmem [thread:$0]  %s22_s19, 1024, %s24_s23, [#allocation3], %s1225_s13, %s1225_s13, %s1226_s14  }
   0xd   :  { %s73_s27 = sshll.u32 %s1350_s4, 4  ;;  %s1230_s0 = smov [#allocation10]   ;;  %s74_s27 = int_to_ptr.hbm [resolvable:$true] %s73_s27 }
   0xe   :  { %55 = dma.hbm_to_vmem [thread:$0]  %s48_s21, 1024, %s50_s24, [#allocation6], %s1225_s13, %s1225_s13, %s1226_s14  }
   0xf   :  { %s75_s28 = sshll.u32 %s1230_s0, 4  ;;  %s76_s28 = int_to_ptr.vmem [resolvable:$true] %s75_s28 }
  0x10   :  { %81 = dma.hbm_to_vmem [thread:$0]  %s74_s27, 1024, %s76_s28, [#allocation9], %s1225_s13, %s1225_s13, %s1226_s14  }
  0x11   :  { %1216 = dma.done.wait [#allocation3], 1024  }
  0x12   :  { %1217 = vsyncadd [#allocation3], 4294966272 }
  0x13   :  { %1218 = dma.done.wait [#allocation6], 2048  }
  0x14   :  { %1219 = vsyncadd [#allocation6], 4294965248 }
  0x15   :  { %1220 = dma.done.wait [#allocation9], 2048  }
  0x16   :  { %1221 = vsyncadd [#allocation9], 4294965248  ;;  %v1026_v0 = vld [vmem:[#allocation7 + $0x38] sm:$0xff]  ;;  %v1025_v1 = vld [vmem:[#allocation7 + $0x30] sm:$0xff]  ;;  %s828_s12 = sshll.u32 %s1354_s8, 4  ;;  %s1232_s13 = smov 128   ;;  %s829_s12 = int_to_ptr.hbm [resolvable:$true] %s828_s12 }
  0x17   :  { %1043 = vmatpush.bf16.msra.mxu2 %v1026_v0  ;;  %252 = vmatpush.bf16.msra.mxu0 %v1026_v0  ;;  %v1024_v2 = vld [vmem:[#allocation7 + $0x28] sm:$0xff]  ;;  %v1023_v3 = vld [vmem:[#allocation7 + $0x20] sm:$0xff]  ;;  %v1022_v4 = vld [vmem:[#allocation7 + $0x18] sm:$0xff]  ;;  %s1233_s14 = smov 8  }
  0x18   :  { %v1021_v5 = vld [vmem:[#allocation7 + $0x10] sm:$0xff]  ;;  %v1020_v6 = vld [vmem:[#allocation7 + $0x8] sm:$0xff]  ;;  %v1019_v7 = vld [vmem:[#allocation7] sm:$0xff] }
  0x19   :  { %v1015_v8 = vld [vmem:[#allocation5 + $0x20] sm:$0xff]  ;;  %v1016_v10 = vld [vmem:[#allocation5 + $0x28] sm:$0xff]  ;;  %v1017_v12 = vld [vmem:[#allocation5 + $0x30] sm:$0xff] }
  0x1a   :  { %v1011_v9 = vld [vmem:[#allocation5] sm:$0xff]  ;;  %v1012_v11 = vld [vmem:[#allocation5 + $0x8] sm:$0xff]  ;;  %v1013_v13 = vld [vmem:[#allocation5 + $0x10] sm:$0xff] }
  0x1b   :  { %1044 = vmatpush.bf16.msra.mxu2 %v1025_v1  ;;  %253 = vmatpush.bf16.msra.mxu0 %v1025_v1  ;;  %v1018_v14 = vld [vmem:[#allocation5 + $0x38] sm:$0xff]  ;;  %v1294_v40 = vld [vmem:[#allocation2] sm:$0xff]  ;;  %v1297_v41 = vld [vmem:[#allocation2 + $0x8] sm:$0xff] }
  0x1c   :  { %v1014_v15 = vld [vmem:[#allocation5 + $0x18] sm:$0xff]  ;;  %v1300_v42 = vld [vmem:[#allocation2 + $0x20] sm:$0xff]  ;;  %v1303_v43 = vld [vmem:[#allocation2 + $0x10] sm:$0xff] }
  0x1d   :  { %v1305_v44 = vld [vmem:[#allocation2 + $0x28] sm:$0xff]  ;;  %v1034_v45 = vld [vmem:[#allocation8 + $0x38] sm:$0xff]  ;;  %v1033_v46 = vld [vmem:[#allocation8 + $0x30] sm:$0xff] }
  0x1e   :  { %v1032_v47 = vld [vmem:[#allocation8 + $0x28] sm:$0xff]  ;;  %v1309_v48 = vld [vmem:[#allocation2 + $0x18] sm:$0xff]  ;;  %v1031_v49 = vld [vmem:[#allocation8 + $0x20] sm:$0xff] }
  0x1f   :  { %1045 = vmatpush.bf16.msra.mxu2 %v1024_v2  ;;  %254 = vmatpush.bf16.msra.mxu0 %v1024_v2  ;;  %v1311_v50 = vld [vmem:[#allocation2 + $0x30] sm:$0xff]  ;;  %v1315_v51 = vld [vmem:[#allocation2 + $0x38] sm:$0xff]  ;;  %v1028_v54 = vld [vmem:[#allocation8 + $0x8] sm:$0xff] }
  0x20   :  { %v1030_v52 = vld [vmem:[#allocation8 + $0x18] sm:$0xff]  ;;  %v1029_v53 = vld [vmem:[#allocation8 + $0x10] sm:$0xff]  ;;  %v1027_v55 = vld [vmem:[#allocation8] sm:$0xff] }
  0x21   :  { %v1069_v57 = vld [vmem:[%s1351_s5] ss:$0 sm:$0xff] }
  0x23   :  { %1046 = vmatpush.bf16.msra.mxu2 %v1023_v3  ;;  %255 = vmatpush.bf16.msra.mxu0 %v1023_v3 }
  0x27   :  { %1047 = vmatpush.bf16.msra.mxu2 %v1022_v4  ;;  %256 = vmatpush.bf16.msra.mxu0 %v1022_v4 }
  0x2b   :  { %1048 = vmatpush.bf16.msra.mxu2 %v1021_v5  ;;  %257 = vmatpush.bf16.msra.mxu0 %v1021_v5 }
  0x2f   :  { %1049 = vmatpush.bf16.msra.mxu2 %v1020_v6  ;;  %258 = vmatpush.bf16.msra.mxu0 %v1020_v6 }
  0x33   :  { %1050 = vmatpush.bf16.msra.mxu2 %v1019_v7  ;;  %259 = vmatpush.bf16.msra.mxu0 %v1019_v7 }
  0x36   :  { %280 = vmatmul.bf16.vlgmr.msra.gmra.mxu2 %v1015_v8  ;;  %260 = vmatmul.bf16.vlgmr.msra.gmra.mxu0 %v1011_v9 }
  0x37   :  { %498 = vmatpush.bf16.msrb.mxu2 %v1034_v45 }
  0x3b   :  { %499 = vmatpush.bf16.msrb.mxu2 %v1033_v46 }
  0x3f   :  { %500 = vmatpush.bf16.msrb.mxu2 %v1032_v47 }
  0x43   :  { %501 = vmatpush.bf16.msrb.mxu2 %v1031_v49 }
  0x46   :  { %285 = vmatmul.bf16.gmra.mxu2 %v1016_v10  ;;  %265 = vmatmul.bf16.gmra.mxu0 %v1012_v11 }
  0x47   :  { %502 = vmatpush.bf16.msrb.mxu2 %v1030_v52 }
  0x4b   :  { %503 = vmatpush.bf16.msrb.mxu2 %v1029_v53 }
  0x4f   :  { %504 = vmatpush.bf16.msrb.mxu2 %v1028_v54 }
  0x53   :  { %505 = vmatpush.bf16.msrb.mxu2 %v1027_v55 }
  0x56   :  { %290 = vmatmul.bf16.gmra.mxu2 %v1017_v12  ;;  %270 = vmatmul.bf16.gmra.mxu0 %v1013_v13 }
  0x66   :  { %295 = vmatmul.bf16.gmra.mxu2 %v1018_v14  ;;  %275 = vmatmul.bf16.gmra.mxu0 %v1014_v15 }
  0xb3   :  { %v261_v17 = vpop.f32.mrf.mxu0 }
  0xb9   :  { %v281_v16 = vpop.f32.mrf.mxu2 }
  0xbb   :  { %v263_v19 = vpop.f32.mrf.mxu0 }
  0xbc   :  { %v301_v39 = vpack.c.bf16 %v263_v19, %v261_v17 }
  0xc1   :  { %v283_v18 = vpop.f32.mrf.mxu2 }
  0xc2   :  { %v305_v34 = vpack.c.bf16 %v283_v18, %v281_v16 }
  0xc3   :  { %v266_v21 = vpop.f32.mrf.mxu0 }
  0xc9   :  { %v286_v20 = vpop.f32.mrf.mxu2 }
  0xcb   :  { %v268_v23 = vpop.f32.mrf.mxu0 }
  0xcc   :  { %v302_v38 = vpack.c.bf16 %v268_v23, %v266_v21 }
  0xd1   :  { %v288_v22 = vpop.f32.mrf.mxu2 }
  0xd2   :  { %v306_v33 = vpack.c.bf16 %v288_v22, %v286_v20 }
  0xd3   :  { %v271_v25 = vpop.f32.mrf.mxu0 }
  0xd9   :  { %v291_v24 = vpop.f32.mrf.mxu2 }
  0xdb   :  { %v273_v28 = vpop.f32.mrf.mxu0 }
  0xdc   :  { %v303_v37 = vpack.c.bf16 %v273_v28, %v271_v25 }
  0xe1   :  { %v293_v26 = vpop.f32.mrf.mxu2 }
  0xe2   :  { %v307_v32 = vpack.c.bf16 %v293_v26, %v291_v24 }
  0xe3   :  { %v276_v31 = vpop.f32.mrf.mxu0 }
  0xe9   :  { %v296_v27 = vpop.f32.mrf.mxu2 }
  0xeb   :  { %v278_v35 = vpop.f32.mrf.mxu0 }
  0xec   :  { %v304_v36 = vpack.c.bf16 %v278_v35, %v276_v31 }
  0xf1   :  { %v298_v29 = vpop.f32.mrf.mxu2 }
  0xf2   :  { %v308_v30 = vpack.c.bf16 %v298_v29, %v296_v27 }
  0xf4   :  { %361 = vmatpush.bf16.msra.mxu1 %v308_v30  ;;  %1051 = vmatpush.bf16.msra.mxu3 %v308_v30 }
  0xf8   :  { %362 = vmatpush.bf16.msra.mxu1 %v307_v32  ;;  %1052 = vmatpush.bf16.msra.mxu3 %v307_v32 }
  0xfc   :  { %363 = vmatpush.bf16.msra.mxu1 %v306_v33  ;;  %1053 = vmatpush.bf16.msra.mxu3 %v306_v33 }
 0x100   :  { %364 = vmatpush.bf16.msra.mxu1 %v305_v34  ;;  %1054 = vmatpush.bf16.msra.mxu3 %v305_v34 }
 0x104   :  { %365 = vmatpush.bf16.msra.mxu1 %v304_v36  ;;  %1055 = vmatpush.bf16.msra.mxu3 %v304_v36 }
 0x108   :  { %366 = vmatpush.bf16.msra.mxu1 %v303_v37  ;;  %1056 = vmatpush.bf16.msra.mxu3 %v303_v37 }
 0x10c   :  { %367 = vmatpush.bf16.msra.mxu1 %v302_v38  ;;  %1057 = vmatpush.bf16.msra.mxu3 %v302_v38 }
 0x110   :  { %368 = vmatpush.bf16.msra.mxu1 %v301_v39  ;;  %1058 = vmatpush.bf16.msra.mxu3 %v301_v39 }
 0x113   :  { %369 = vmatmul.bf16.vlgmr.msra.gmra.mxu1 %v1294_v40  ;;  %389 = vmatmul.bf16.vlgmr.msra.gmra.mxu3 %v1300_v42 }
 0x123   :  { %374 = vmatmul.bf16.gmra.mxu1 %v1297_v41  ;;  %394 = vmatmul.bf16.gmra.mxu3 %v1305_v44 }
 0x133   :  { %379 = vmatmul.bf16.gmra.mxu1 %v1303_v43  ;;  %399 = vmatmul.bf16.gmra.mxu3 %v1311_v50 }
 0x143   :  { %384 = vmatmul.bf16.gmra.mxu1 %v1309_v48  ;;  %404 = vmatmul.bf16.gmra.mxu3 %v1315_v51 }
 0x190   :  { %v370_v56 = vpop.f32.mrf.mxu1 }
 0x191   :  { %v371_v58 = vadd.f32 %v1069_v57, %v370_v56 }
 0x193   :  { %v410_v61 = vmax.f32 %v371_v58, 0.0 }
 0x196   :  { %v390_v13 = vpop.f32.mrf.mxu3 }
 0x197   :  { %v391_v24 = vadd.f32 %v1069_v57, %v390_v13 }
 0x198   :  { %v372_v59 = vpop.f32.mrf.mxu1 }
 0x199   :  { %v373_v60 = vadd.f32 %v1069_v57, %v372_v59  ;;  %v418_v26 = vmax.f32 %v391_v24, 0.0  ;;  %v1035_v24 = vld [vmem:[#allocation10] sm:$0xff] }
 0x19b   :  { %v411_v62 = vmax.f32 %v373_v60, 0.0 }
 0x19d   :  { %v426_v63 = vpack.c.bf16 %v411_v62, %v410_v61 }
 0x19e   :  { %v392_v16 = vpop.f32.mrf.mxu3 }
 0x19f   :  { %506 = vmatmul.bf16.vlgmr.msrb.gmra.mxu2 %v426_v63  ;;  %v393_v25 = vadd.f32 %v1069_v57, %v392_v16 }
 0x1a0   :  { %v375_v0 = vpop.f32.mrf.mxu1 }
 0x1a1   :  { %v376_v1 = vadd.f32 %v1069_v57, %v375_v0  ;;  %v419_v27 = vmax.f32 %v393_v25, 0.0 }
 0x1a3   :  { %v412_v4 = vmax.f32 %v376_v1, 0.0  ;;  %v430_v29 = vpack.c.bf16 %v419_v27, %v418_v26  ;;  %v1070_v26 = vld [vmem:[%s1352_s6] ss:$0 sm:$0xff] }
 0x1a6   :  { %v395_v23 = vpop.f32.mrf.mxu3 }
 0x1a7   :  { %v396_v31 = vadd.f32 %v1069_v57, %v395_v23  ;;  %v1036_v23 = vld [vmem:[#allocation10 + $0x8] sm:$0xff] }
 0x1a8   :  { %v377_v2 = vpop.f32.mrf.mxu1 }
 0x1a9   :  { %v378_v3 = vadd.f32 %v1069_v57, %v377_v2  ;;  %v420_v33 = vmax.f32 %v396_v31, 0.0 }
 0x1ab   :  { %v413_v5 = vmax.f32 %v378_v3, 0.0 }
 0x1ad   :  { %v427_v6 = vpack.c.bf16 %v413_v5, %v412_v4 }
 0x1ae   :  { %v397_v28 = vpop.f32.mrf.mxu3 }
 0x1af   :  { %511 = vmatmul.bf16.gmra.mxu2 %v427_v6  ;;  %v398_v32 = vadd.f32 %v1069_v57, %v397_v28 }
 0x1b0   :  { %v380_v7 = vpop.f32.mrf.mxu1 }
 0x1b1   :  { %v381_v8 = vadd.f32 %v1069_v57, %v380_v7  ;;  %v421_v34 = vmax.f32 %v398_v32, 0.0 }
 0x1b3   :  { %v414_v11 = vmax.f32 %v381_v8, 0.0  ;;  %v431_v35 = vpack.c.bf16 %v421_v34, %v420_v33 }
 0x1b6   :  { %v400_v30 = vpop.f32.mrf.mxu3 }
 0x1b7   :  { %v401_v37 = vadd.f32 %v1069_v57, %v400_v30 }
 0x1b8   :  { %v382_v9 = vpop.f32.mrf.mxu1 }
 0x1b9   :  { %v383_v10 = vadd.f32 %v1069_v57, %v382_v9  ;;  %v422_v45 = vmax.f32 %v401_v37, 0.0 }
 0x1bb   :  { %v415_v12 = vmax.f32 %v383_v10, 0.0 }
 0x1bd   :  { %v428_v14 = vpack.c.bf16 %v415_v12, %v414_v11 }
 0x1be   :  { %v402_v36 = vpop.f32.mrf.mxu3 }
 0x1bf   :  { %516 = vmatmul.bf16.gmra.mxu2 %v428_v14  ;;  %v403_v38 = vadd.f32 %v1069_v57, %v402_v36 }
 0x1c0   :  { %v385_v15 = vpop.f32.mrf.mxu1 }
 0x1c1   :  { %v386_v17 = vadd.f32 %v1069_v57, %v385_v15  ;;  %v423_v46 = vmax.f32 %v403_v38, 0.0 }
 0x1c3   :  { %v416_v20 = vmax.f32 %v386_v17, 0.0  ;;  %v432_v47 = vpack.c.bf16 %v423_v46, %v422_v45  ;;  %v1042_v17 = vld [vmem:[#allocation10 + $0x38] sm:$0xff] }
 0x1c4   :  { %696 = vmatpush.bf16.msrb.mxu0 %v1042_v17 }
 0x1c6   :  { %v405_v39 = vpop.f32.mrf.mxu3 }
 0x1c7   :  { %v406_v52 = vadd.f32 %v1069_v57, %v405_v39 }
 0x1c8   :  { %v387_v18 = vpop.f32.mrf.mxu1 }
 0x1c9   :  { %v388_v19 = vadd.f32 %v1069_v57, %v387_v18  ;;  %v424_v54 = vmax.f32 %v406_v52, 0.0  ;;  %v1041_v18 = vld [vmem:[#allocation10 + $0x30] sm:$0xff] }
 0x1ca   :  { %697 = vmatpush.bf16.msrb.mxu0 %v1041_v18 }
 0x1cb   :  { %v417_v21 = vmax.f32 %v388_v19, 0.0  ;;  %v1040_v19 = vld [vmem:[#allocation10 + $0x28] sm:$0xff] }
 0x1cd   :  { %v429_v22 = vpack.c.bf16 %v417_v21, %v416_v20  ;;  %v1039_v20 = vld [vmem:[#allocation10 + $0x20] sm:$0xff]  ;;  %v1038_v21 = vld [vmem:[#allocation10 + $0x18] sm:$0xff] }
 0x1ce   :  { %v407_v49 = vpop.f32.mrf.mxu3  ;;  %698 = vmatpush.bf16.msrb.mxu0 %v1040_v19 }
 0x1cf   :  { %521 = vmatmul.bf16.gmra.mxu2 %v429_v22  ;;  %v408_v53 = vadd.f32 %v1069_v57, %v407_v49  ;;  %v1037_v22 = vld [vmem:[#allocation10 + $0x10] sm:$0xff] }
 0x1d1   :  { %v425_v55 = vmax.f32 %v408_v53, 0.0 }
 0x1d2   :  { %699 = vmatpush.bf16.msrb.mxu0 %v1039_v20 }
 0x1d3   :  { %v433_v56 = vpack.c.bf16 %v425_v55, %v424_v54 }
 0x1d6   :  { %700 = vmatpush.bf16.msrb.mxu0 %v1038_v21 }
 0x1da   :  { %701 = vmatpush.bf16.msrb.mxu0 %v1037_v22 }
 0x1de   :  { %702 = vmatpush.bf16.msrb.mxu0 %v1036_v23 }
 0x1df   :  { %526 = vmatmul.bf16.gmra.mxu2 %v430_v29 }
 0x1e2   :  { %703 = vmatpush.bf16.msrb.mxu0 %v1035_v24 }
 0x1ef   :  { %531 = vmatmul.bf16.gmra.mxu2 %v431_v35 }
 0x1ff   :  { %536 = vmatmul.bf16.gmra.mxu2 %v432_v47 }
 0x20f   :  { %541 = vmatmul.bf16.gmra.mxu2 %v433_v56 }
 0x222   :  { %v507_v58 = vpop.f32.mrf.mxu2 }
 0x22a   :  { %v509_v59 = vpop.f32.mrf.mxu2 }
 0x22b   :  { %v547_v60 = vpack.c.bf16 %v509_v59, %v507_v58 }
 0x232   :  { %v512_v61 = vpop.f32.mrf.mxu2 }
 0x23a   :  { %v514_v62 = vpop.f32.mrf.mxu2 }
 0x23b   :  { %v548_v63 = vpack.c.bf16 %v514_v62, %v512_v61 }
 0x242   :  { %v517_v0 = vpop.f32.mrf.mxu2 }
 0x24a   :  { %v519_v1 = vpop.f32.mrf.mxu2 }
 0x24b   :  { %v549_v2 = vpack.c.bf16 %v519_v1, %v517_v0 }
 0x252   :  { %v522_v3 = vpop.f32.mrf.mxu2 }
 0x25a   :  { %v524_v4 = vpop.f32.mrf.mxu2 }
 0x25b   :  { %v550_v5 = vpack.c.bf16 %v524_v4, %v522_v3 }
 0x262   :  { %v527_v6 = vpop.f32.mrf.mxu2 }
 0x26a   :  { %v529_v7 = vpop.f32.mrf.mxu2 }
 0x26b   :  { %v551_v16 = vpack.c.bf16 %v529_v7, %v527_v6 }
 0x272   :  { %v532_v8 = vpop.f32.mrf.mxu2 }
 0x27a   :  { %v534_v57 = vpop.f32.mrf.mxu2 }
 0x27b   :  { %v552_v15 = vpack.c.bf16 %v534_v57, %v532_v8 }
 0x282   :  { %v537_v9 = vpop.f32.mrf.mxu2 }
 0x28a   :  { %v539_v10 = vpop.f32.mrf.mxu2 }
 0x28b   :  { %v553_v14 = vpack.c.bf16 %v539_v10, %v537_v9 }
 0x292   :  { %v542_v11 = vpop.f32.mrf.mxu2 }
 0x29a   :  { %v544_v12 = vpop.f32.mrf.mxu2 }
 0x29b   :  { %v554_v13 = vpack.c.bf16 %v544_v12, %v542_v11 }
 0x29d   :  { %559 = vmatpush.bf16.msrb.mxu3 %v554_v13 }
 0x2a1   :  { %560 = vmatpush.bf16.msrb.mxu3 %v553_v14 }
 0x2a5   :  { %561 = vmatpush.bf16.msrb.mxu3 %v552_v15 }
 0x2a9   :  { %562 = vmatpush.bf16.msrb.mxu3 %v551_v16 }
 0x2ad   :  { %563 = vmatpush.bf16.msrb.mxu3 %v550_v5 }
 0x2b1   :  { %564 = vmatpush.bf16.msrb.mxu3 %v549_v2 }
 0x2b5   :  { %565 = vmatpush.bf16.msrb.mxu3 %v548_v63 }
 0x2b9   :  { %566 = vmatpush.bf16.msrb.mxu3 %v547_v60 }
 0x2bc   :  { %567 = vmatmul.bf16.vlgmr.msrb.gmra.mxu3 %v1294_v40 }
 0x2cc   :  { %572 = vmatmul.bf16.gmra.mxu3 %v1297_v41 }
 0x2dc   :  { %577 = vmatmul.bf16.gmra.mxu3 %v1303_v43 }
 0x2ec   :  { %582 = vmatmul.bf16.gmra.mxu3 %v1309_v48 }
 0x2fc   :  { %587 = vmatmul.bf16.gmra.mxu3 %v1300_v42 }
 0x30c   :  { %592 = vmatmul.bf16.gmra.mxu3 %v1305_v44 }
 0x31c   :  { %597 = vmatmul.bf16.gmra.mxu3 %v1311_v50 }
 0x32c   :  { %602 = vmatmul.bf16.gmra.mxu3 %v1315_v51 }
 0x33f   :  { %v568_v25 = vpop.f32.mrf.mxu3 }
 0x340   :  { %v569_v27 = vadd.f32 %v1070_v26, %v568_v25 }
 0x342   :  { %v608_v30 = vmax.f32 %v569_v27, 0.0 }
 0x347   :  { %v570_v28 = vpop.f32.mrf.mxu3 }
 0x348   :  { %v571_v29 = vadd.f32 %v1070_v26, %v570_v28 }
 0x34a   :  { %v609_v31 = vmax.f32 %v571_v29, 0.0 }
 0x34c   :  { %v624_v32 = vpack.c.bf16 %v609_v31, %v608_v30 }
 0x34e   :  { %704 = vmatmul.bf16.vlgmr.msrb.gmra.mxu0 %v624_v32 }
 0x34f   :  { %v573_v33 = vpop.f32.mrf.mxu3 }
 0x350   :  { %v574_v34 = vadd.f32 %v1070_v26, %v573_v33 }
 0x352   :  { %v610_v37 = vmax.f32 %v574_v34, 0.0 }
 0x357   :  { %v575_v35 = vpop.f32.mrf.mxu3 }
 0x358   :  { %v576_v36 = vadd.f32 %v1070_v26, %v575_v35 }
 0x35a   :  { %v611_v38 = vmax.f32 %v576_v36, 0.0 }
 0x35c   :  { %v625_v39 = vpack.c.bf16 %v611_v38, %v610_v37 }
 0x35e   :  { %709 = vmatmul.bf16.gmra.mxu0 %v625_v39 }
 0x35f   :  { %v578_v45 = vpop.f32.mrf.mxu3 }
 0x360   :  { %v579_v46 = vadd.f32 %v1070_v26, %v578_v45 }
 0x362   :  { %v612_v52 = vmax.f32 %v579_v46, 0.0 }
 0x367   :  { %v580_v47 = vpop.f32.mrf.mxu3 }
 0x368   :  { %v581_v49 = vadd.f32 %v1070_v26, %v580_v47 }
 0x36a   :  { %v613_v53 = vmax.f32 %v581_v49, 0.0 }
 0x36c   :  { %v626_v54 = vpack.c.bf16 %v613_v53, %v612_v52 }
 0x36e   :  { %714 = vmatmul.bf16.gmra.mxu0 %v626_v54 }
 0x36f   :  { %v583_v55 = vpop.f32.mrf.mxu3 }
 0x370   :  { %v584_v56 = vadd.f32 %v1070_v26, %v583_v55 }
 0x372   :  { %v614_v60 = vmax.f32 %v584_v56, 0.0 }
 0x377   :  { %v585_v58 = vpop.f32.mrf.mxu3 }
 0x378   :  { %v586_v59 = vadd.f32 %v1070_v26, %v585_v58 }
 0x37a   :  { %v615_v61 = vmax.f32 %v586_v59, 0.0  ;;  %v1071_v59 = vld [vmem:[%s1353_s7] ss:$0 sm:$0xff]  ;;  %s1231_s7 = smov [#allocation11]  }
 0x37b   :  { %s826_s9 = sshll.u32 %s1231_s7, 4  ;;  %s827_s9 = int_to_ptr.vmem [resolvable:$true] %s826_s9 }
 0x37c   :  { %v627_v62 = vpack.c.bf16 %v615_v61, %v614_v60 }
 0x37e   :  { %719 = vmatmul.bf16.gmra.mxu0 %v627_v62 }
 0x37f   :  { %v588_v63 = vpop.f32.mrf.mxu3 }
 0x380   :  { %v589_v0 = vadd.f32 %v1070_v26, %v588_v63 }
 0x382   :  { %v616_v3 = vmax.f32 %v589_v0, 0.0 }
 0x387   :  { %v590_v1 = vpop.f32.mrf.mxu3 }
 0x388   :  { %v591_v2 = vadd.f32 %v1070_v26, %v590_v1 }
 0x38a   :  { %v617_v4 = vmax.f32 %v591_v2, 0.0 }
 0x38c   :  { %v628_v5 = vpack.c.bf16 %v617_v4, %v616_v3 }
 0x38e   :  { %724 = vmatmul.bf16.gmra.mxu0 %v628_v5 }
 0x38f   :  { %v593_v6 = vpop.f32.mrf.mxu3 }
 0x390   :  { %v594_v7 = vadd.f32 %v1070_v26, %v593_v6 }
 0x392   :  { %v618_v9 = vmax.f32 %v594_v7, 0.0 }
 0x397   :  { %v595_v8 = vpop.f32.mrf.mxu3 }
 0x398   :  { %v596_v57 = vadd.f32 %v1070_v26, %v595_v8 }
 0x39a   :  { %v619_v10 = vmax.f32 %v596_v57, 0.0 }
 0x39c   :  { %v629_v11 = vpack.c.bf16 %v619_v10, %v618_v9 }
 0x39e   :  { %729 = vmatmul.bf16.gmra.mxu0 %v629_v11 }
 0x39f   :  { %v598_v12 = vpop.f32.mrf.mxu3 }
 0x3a0   :  { %v599_v13 = vadd.f32 %v1070_v26, %v598_v12 }
 0x3a2   :  { %v620_v16 = vmax.f32 %v599_v13, 0.0 }
 0x3a7   :  { %v600_v14 = vpop.f32.mrf.mxu3 }
 0x3a8   :  { %v601_v15 = vadd.f32 %v1070_v26, %v600_v14 }
 0x3aa   :  { %v621_v17 = vmax.f32 %v601_v15, 0.0 }
 0x3ac   :  { %v630_v18 = vpack.c.bf16 %v621_v17, %v620_v16 }
 0x3ae   :  { %734 = vmatmul.bf16.gmra.mxu0 %v630_v18 }
 0x3af   :  { %v603_v19 = vpop.f32.mrf.mxu3 }
 0x3b0   :  { %v604_v20 = vadd.f32 %v1070_v26, %v603_v19 }
 0x3b2   :  { %v622_v23 = vmax.f32 %v604_v20, 0.0 }
 0x3b7   :  { %v605_v21 = vpop.f32.mrf.mxu3 }
 0x3b8   :  { %v606_v22 = vadd.f32 %v1070_v26, %v605_v21 }
 0x3ba   :  { %v623_v24 = vmax.f32 %v606_v22, 0.0 }
 0x3bc   :  { %v631_v25 = vpack.c.bf16 %v623_v24, %v622_v23 }
 0x3be   :  { %739 = vmatmul.bf16.gmra.mxu0 %v631_v25 }
 0x3cb   :  { %v705_v27 = vpop.f32.mrf.mxu0 }
 0x3d3   :  { %v707_v28 = vpop.f32.mrf.mxu0 }
 0x3d4   :  { %v745_v29 = vpack.c.bf16 %v707_v28, %v705_v27 }
 0x3db   :  { %v710_v30 = vpop.f32.mrf.mxu0 }
 0x3e3   :  { %v712_v31 = vpop.f32.mrf.mxu0 }
 0x3e4   :  { %v746_v32 = vpack.c.bf16 %v712_v31, %v710_v30 }
 0x3eb   :  { %v715_v33 = vpop.f32.mrf.mxu0 }
 0x3f3   :  { %v717_v34 = vpop.f32.mrf.mxu0 }
 0x3f4   :  { %v747_v35 = vpack.c.bf16 %v717_v34, %v715_v33 }
 0x3fb   :  { %v720_v36 = vpop.f32.mrf.mxu0 }
 0x403   :  { %v722_v37 = vpop.f32.mrf.mxu0 }
 0x404   :  { %v748_v38 = vpack.c.bf16 %v722_v37, %v720_v36 }
 0x40b   :  { %v725_v39 = vpop.f32.mrf.mxu0 }
 0x413   :  { %v727_v45 = vpop.f32.mrf.mxu0 }
 0x414   :  { %v749_v58 = vpack.c.bf16 %v727_v45, %v725_v39 }
 0x41b   :  { %v730_v46 = vpop.f32.mrf.mxu0 }
 0x423   :  { %v732_v26 = vpop.f32.mrf.mxu0 }
 0x424   :  { %v750_v56 = vpack.c.bf16 %v732_v26, %v730_v46 }
 0x42b   :  { %v735_v47 = vpop.f32.mrf.mxu0 }
 0x433   :  { %v737_v49 = vpop.f32.mrf.mxu0 }
 0x434   :  { %v751_v55 = vpack.c.bf16 %v737_v49, %v735_v47 }
 0x43b   :  { %v740_v52 = vpop.f32.mrf.mxu0 }
 0x443   :  { %v742_v53 = vpop.f32.mrf.mxu0 }
 0x444   :  { %v752_v54 = vpack.c.bf16 %v742_v53, %v740_v52 }
 0x446   :  { %757 = vmatpush.bf16.msrb.mxu1 %v752_v54 }
 0x44a   :  { %758 = vmatpush.bf16.msrb.mxu1 %v751_v55 }
 0x44e   :  { %759 = vmatpush.bf16.msrb.mxu1 %v750_v56 }
 0x452   :  { %760 = vmatpush.bf16.msrb.mxu1 %v749_v58 }
 0x456   :  { %761 = vmatpush.bf16.msrb.mxu1 %v748_v38 }
 0x45a   :  { %762 = vmatpush.bf16.msrb.mxu1 %v747_v35 }
 0x45e   :  { %763 = vmatpush.bf16.msrb.mxu1 %v746_v32 }
 0x462   :  { %764 = vmatpush.bf16.msrb.mxu1 %v745_v29 }
 0x465   :  { %765 = vmatmul.bf16.vlgmr.msrb.gmra.mxu1 %v1294_v40 }
 0x475   :  { %770 = vmatmul.bf16.gmra.mxu1 %v1297_v41 }
 0x485   :  { %775 = vmatmul.bf16.gmra.mxu1 %v1303_v43 }
 0x495   :  { %780 = vmatmul.bf16.gmra.mxu1 %v1309_v48 }
 0x4a5   :  { %785 = vmatmul.bf16.gmra.mxu1 %v1300_v42 }
 0x4b5   :  { %790 = vmatmul.bf16.gmra.mxu1 %v1305_v44 }
 0x4c5   :  { %795 = vmatmul.bf16.gmra.mxu1 %v1311_v50 }
 0x4d5   :  { %800 = vmatmul.bf16.gmra.mxu1 %v1315_v51 }
 0x4e2   :  { %v766_v60 = vpop.f32.mrf.mxu1 }
 0x4e3   :  { %v767_v40 = vadd.f32 %v1071_v59, %v766_v60 }
 0x4e5   :  { %806 = vst [vmem:[#allocation11] sm:$0xff] %v767_v40 }
 0x4ea   :  { %v768_v41 = vpop.f32.mrf.mxu1 }
 0x4eb   :  { %v769_v61 = vadd.f32 %v1071_v59, %v768_v41 }
 0x4ed   :  { %807 = vst [vmem:[#allocation11 + $0x8] sm:$0xff] %v769_v61 }
 0x4f2   :  { %v771_v43 = vpop.f32.mrf.mxu1 }
 0x4f3   :  { %v772_v48 = vadd.f32 %v1071_v59, %v771_v43 }
 0x4f5   :  { %808 = vst [vmem:[#allocation11 + $0x10] sm:$0xff] %v772_v48 }
 0x4fa   :  { %v773_v42 = vpop.f32.mrf.mxu1 }
 0x4fb   :  { %v774_v62 = vadd.f32 %v1071_v59, %v773_v42 }
 0x4fd   :  { %809 = vst [vmem:[#allocation11 + $0x18] sm:$0xff] %v774_v62 }
 0x502   :  { %v776_v44 = vpop.f32.mrf.mxu1 }
 0x503   :  { %v777_v50 = vadd.f32 %v1071_v59, %v776_v44 }
 0x505   :  { %810 = vst [vmem:[#allocation11 + $0x20] sm:$0xff] %v777_v50 }
 0x50a   :  { %v778_v51 = vpop.f32.mrf.mxu1 }
 0x50b   :  { %v779_v63 = vadd.f32 %v1071_v59, %v778_v51 }
 0x50d   :  { %811 = vst [vmem:[#allocation11 + $0x28] sm:$0xff] %v779_v63 }
 0x512   :  { %v781_v0 = vpop.f32.mrf.mxu1 }
 0x513   :  { %v782_v1 = vadd.f32 %v1071_v59, %v781_v0 }
 0x515   :  { %812 = vst [vmem:[#allocation11 + $0x30] sm:$0xff] %v782_v1 }
 0x51a   :  { %v783_v2 = vpop.f32.mrf.mxu1 }
 0x51b   :  { %v784_v3 = vadd.f32 %v1071_v59, %v783_v2 }
 0x51d   :  { %813 = vst [vmem:[#allocation11 + $0x38] sm:$0xff] %v784_v3 }
 0x522   :  { %v786_v4 = vpop.f32.mrf.mxu1 }
 0x523   :  { %v787_v5 = vadd.f32 %v1071_v59, %v786_v4 }
 0x525   :  { %814 = vst [vmem:[#allocation11 + $0x40] sm:$0xff] %v787_v5 }
 0x52a   :  { %v788_v6 = vpop.f32.mrf.mxu1 }
 0x52b   :  { %v789_v7 = vadd.f32 %v1071_v59, %v788_v6 }
 0x52d   :  { %815 = vst [vmem:[#allocation11 + $0x48] sm:$0xff] %v789_v7 }
 0x532   :  { %v791_v8 = vpop.f32.mrf.mxu1 }
 0x533   :  { %v792_v57 = vadd.f32 %v1071_v59, %v791_v8 }
 0x535   :  { %816 = vst [vmem:[#allocation11 + $0x50] sm:$0xff] %v792_v57 }
 0x53a   :  { %v793_v9 = vpop.f32.mrf.mxu1 }
 0x53b   :  { %v794_v10 = vadd.f32 %v1071_v59, %v793_v9 }
 0x53d   :  { %817 = vst [vmem:[#allocation11 + $0x58] sm:$0xff] %v794_v10 }
 0x542   :  { %v796_v11 = vpop.f32.mrf.mxu1 }
 0x543   :  { %v797_v12 = vadd.f32 %v1071_v59, %v796_v11 }
 0x545   :  { %818 = vst [vmem:[#allocation11 + $0x60] sm:$0xff] %v797_v12 }
 0x54a   :  { %v798_v13 = vpop.f32.mrf.mxu1 }
 0x54b   :  { %v799_v14 = vadd.f32 %v1071_v59, %v798_v13 }
 0x54d   :  { %819 = vst [vmem:[#allocation11 + $0x68] sm:$0xff] %v799_v14 }
 0x552   :  { %v801_v15 = vpop.f32.mrf.mxu1 }
 0x553   :  { %v802_v16 = vadd.f32 %v1071_v59, %v801_v15 }
 0x555   :  { %820 = vst [vmem:[#allocation11 + $0x70] sm:$0xff] %v802_v16 }
 0x55a   :  { %v803_v17 = vpop.f32.mrf.mxu1 }
 0x55b   :  { %v804_v18 = vadd.f32 %v1071_v59, %v803_v17 }
 0x55d   :  { %821 = vst [vmem:[#allocation11 + $0x78] sm:$0xff] %v804_v18 }
 0x55e   :  { %834 = dma.vmem_to_hbm [thread:$0]  %s827_s9, 2048, %s829_s12, [#allocation4], %s1232_s13, %s1232_s13, %s1233_s14  }
 0x55f   :  { %1222 = dma.done.wait [#allocation4], 2048  }
 0x560   :  { %1223 = vsyncadd [#allocation4], 4294965248 }
 0x561   :  { %839 = vsyncpa [#allocation3], 1 }
 0x562   :  { %840 = vsyncpa [#allocation6], 1 }
 0x563   :  { %841 = vsyncpa [#allocation9], 1 }
 0x564   :  { %842 = vsyncpa [#allocation4], 1 }

</bundles_post_ra>
